<compile_context>
chip_gen: v7x
topology: tpu7x:2x2x1
jax: 0.10.0
libtpu: 0.0.40
codegen_flags: <defaults>
</compile_context>

<pallas_src>
import functools

import jax
import jax.numpy as jnp
from jax import lax
from jax.experimental import pallas as pl
from jax.experimental.pallas import tpu as pltpu

BN_EPS = 1e-5  # nn.BatchNorm2d default eps


def _round_up(n, m):
    return ((n + m - 1) // m) * m


# ----------------------------------------------------------------------------
# Fused kernel: im2col matmul (conv) + eval-mode BatchNorm2d affine
# ----------------------------------------------------------------------------
def patch_embed_kernel(p_ref, w_ref, g_ref, b_ref, mu_ref, var_ref, o_ref):
    # p_ref  : (TM, K)  im2col patches (f32 in VMEM, cast to bf16 at the dot)
    # w_ref  : (K, E)   conv weight, pre-cast to bf16 in the wrapper
    # g/b/mu/var_ref : (1, E) BatchNorm2d weight/bias/running_mean/running_var (f32)
    # o_ref  : (TM, E)  lane-dense output tile (f32)
    acc = jnp.dot(p_ref[...].astype(jnp.bfloat16), w_ref[...],
                  preferred_element_type=jnp.float32)            # MXU, f32 acc
    scale = g_ref[...] * lax.rsqrt(var_ref[...] + BN_EPS)        # (1, E) EUP rsqrt
    shift = b_ref[...] - mu_ref[...] * scale                     # (1, E)
    o_ref[...] = acc * scale + shift                             # VPU, broadcast


# ----------------------------------------------------------------------------
# Wrapper
# ----------------------------------------------------------------------------
def patch_embed(x, params, *, patch_size, patch_stride, block_m=256):
    """x: (B, C, H, W) f32 NCHW. Returns (B, E, Hp, Wp) NCHW like PyTorch."""
    if patch_size != patch_stride:
        # TODO(synk): overlapping patches (stride != kernel) need a real im2col gather.
        raise NotImplementedError("only non-overlapping patch embed (size == stride)")
    B, C, H, W = x.shape
    p = patch_size
    Hp, Wp = H // p, W // p
    E = params["proj_w"].shape[0]
    K = C * p * p
    M = B * Hp * Wp

    # Non-overlapping im2col: one relayout op; element order (c, kh, kw) matches
    # torch's Conv2d weight flattening.
    patches = jnp.transpose(
        x.reshape(B, C, Hp, p, Wp, p), (0, 2, 4, 1, 3, 5)).reshape(M, K)

    # torch weight (E, C, p, p) -> (K, E); pre-cast to bf16 (parameter prep).
    w = jnp.transpose(params["proj_w"].reshape(E, K), (1, 0)).astype(jnp.bfloat16)

    gamma = params["bn_gamma"].reshape(1, E).astype(jnp.float32)
    beta = params["bn_beta"].reshape(1, E).astype(jnp.float32)
    mean = params["bn_mean"].reshape(1, E).astype(jnp.float32)
    var = params["bn_var"].reshape(1, E).astype(jnp.float32)

    # Tile only the patch axis; keep steps few and fat (per-step overhead ~0.35us).
    tm = min(block_m, _round_up(M, 8))
    Mp = _round_up(M, tm)
    if Mp != M:
        patches = jnp.pad(patches, ((0, Mp - M), (0, 0)))

    out = pl.pallas_call(
        patch_embed_kernel,
        out_shape=jax.ShapeDtypeStruct((Mp, E), jnp.float32),
        grid_spec=pl.GridSpec(
            grid=(Mp // tm,),
            in_specs=[
                pl.BlockSpec((tm, K), lambda i: (i, 0)),   # patches tile
                pl.BlockSpec((K, E), lambda i: (0, 0)),    # conv weight (bf16)
                pl.BlockSpec((1, E), lambda i: (0, 0)),    # bn gamma
                pl.BlockSpec((1, E), lambda i: (0, 0)),    # bn beta
                pl.BlockSpec((1, E), lambda i: (0, 0)),    # bn running_mean
                pl.BlockSpec((1, E), lambda i: (0, 0)),    # bn running_var
            ],
            out_specs=pl.BlockSpec((tm, E), lambda i: (i, 0)),
        ),
        compiler_params=pltpu.CompilerParams(
            dimension_semantics=("parallel",)),
    )(patches, w, gamma, beta, mean, var)

    out = out[:M].reshape(B, Hp, Wp, E)
    return jnp.transpose(out, (0, 3, 1, 2))  # back to NCHW like the module


# ----------------------------------------------------------------------------
# Pure-JAX reference (f32 conv + eval-mode BatchNorm2d) for validation
# ----------------------------------------------------------------------------
def reference(x, params, *, patch_size, patch_stride):
    conv = lax.conv_general_dilated(
        x, params["proj_w"], (patch_stride, patch_stride), "VALID",
        dimension_numbers=("NCHW", "OIHW", "NCHW"))
    scale = params["bn_gamma"] / jnp.sqrt(params["bn_var"] + BN_EPS)
    shift = params["bn_beta"] - params["bn_mean"] * scale
    return conv * scale[None, :, None, None] + shift[None, :, None, None]


if __name__ == "__main__":
    B, C, H, W = 2, 4, 16, 16
    patch_size = patch_stride = 4
    E = 128  # embed_dim (lane-dense last dim)

    keys = jax.random.split(jax.random.PRNGKey(0), 6)
    x = jax.random.normal(keys[0], (B, C, H, W), jnp.float32)
    params = dict(
        proj_w=0.1 * jax.random.normal(
            keys[1], (E, C, patch_size, patch_size), jnp.float32),
        bn_gamma=1.0 + 0.1 * jax.random.normal(keys[2], (E,), jnp.float32),
        bn_beta=0.1 * jax.random.normal(keys[3], (E,), jnp.float32),
        bn_mean=0.1 * jax.random.normal(keys[4], (E,), jnp.float32),
        bn_var=1.0 + 0.1 * jnp.abs(jax.random.normal(keys[5], (E,), jnp.float32)),
    )

    fn = jax.jit(functools.partial(
        patch_embed, patch_size=patch_size, patch_stride=patch_stride))
    out = fn(x, params)
    jax.block_until_ready(out)

    ref = reference(x, params, patch_size=patch_size, patch_stride=patch_stride)
    assert out.shape == ref.shape, (out.shape, ref.shape)
    err = float(jnp.max(jnp.abs(out - ref)))
    # bf16 matmul operands (f32 accumulation) -> slightly looser tolerance.
    assert jnp.allclose(out, ref, atol=2e-2, rtol=2e-2), err
    print("KERNEL_OK")
</pallas_src>

<mosaic_0001>
module attributes {stable_mosaic.version = 11 : i64} {
  func.func @patch_embed_kernel(%arg0: i32, %arg1: memref<32x64xf32, #tpu.memory_space<vmem>>, %arg2: memref<64x128xbf16, #tpu.memory_space<vmem>>, %arg3: memref<1x128xf32, #tpu.memory_space<vmem>>, %arg4: memref<1x128xf32, #tpu.memory_space<vmem>>, %arg5: memref<1x128xf32, #tpu.memory_space<vmem>>, %arg6: memref<1x128xf32, #tpu.memory_space<vmem>>, %arg7: memref<32x128xf32, #tpu.memory_space<vmem>>) attributes {dimension_semantics = [#tpu.dimension_semantics<parallel>], iteration_bounds = array<i64: 1>, scalar_prefetch = 0 : i64, scratch_operands = 0 : i64, tpu.core_type = #tpu.core_type<tc>, window_params = [{transform_indices = @transform_0, window_bounds = array<i64: 32, 64>}, {pipeline_mode = #tpu.pipeline_mode<synchronous>, transform_indices = @transform_1, window_bounds = array<i64: 64, 128>}, {pipeline_mode = #tpu.pipeline_mode<synchronous>, transform_indices = @transform_2, window_bounds = array<i64: 1, 128>}, {pipeline_mode = #tpu.pipeline_mode<synchronous>, transform_indices = @transform_3, window_bounds = array<i64: 1, 128>}, {pipeline_mode = #tpu.pipeline_mode<synchronous>, transform_indices = @transform_4, window_bounds = array<i64: 1, 128>}, {pipeline_mode = #tpu.pipeline_mode<synchronous>, transform_indices = @transform_5, window_bounds = array<i64: 1, 128>}, {transform_indices = @transform_6, window_bounds = array<i64: 32, 128>}]} {
    %c0 = arith.constant 0 : index
    %c0_0 = arith.constant 0 : index
    %0 = vector.load %arg1[%c0, %c0_0] : memref<32x64xf32, #tpu.memory_space<vmem>>, vector<32x64xf32>
    %1 = arith.truncf %0 : vector<32x64xf32> to vector<32x64xbf16>
    %c0_1 = arith.constant 0 : index
    %c0_2 = arith.constant 0 : index
    %2 = vector.load %arg2[%c0_1, %c0_2] : memref<64x128xbf16, #tpu.memory_space<vmem>>, vector<64x128xbf16>
    %cst = arith.constant dense<0.000000e+00> : vector<32x128xf32>
    %3 = tpu.matmul %1, %2, %cst {dimension_numbers = #tpu.dot_dimension_numbers<[1], [0], [0], [1], [0, 0, 1, 1], [], []>} : vector<32x64xbf16>, vector<64x128xbf16>, vector<32x128xf32> -> vector<32x128xf32>
    %c0_3 = arith.constant 0 : index
    %c0_4 = arith.constant 0 : index
    %4 = vector.load %arg3[%c0_3, %c0_4] : memref<1x128xf32, #tpu.memory_space<vmem>>, vector<1x128xf32>
    %c0_5 = arith.constant 0 : index
    %c0_6 = arith.constant 0 : index
    %5 = vector.load %arg6[%c0_5, %c0_6] : memref<1x128xf32, #tpu.memory_space<vmem>>, vector<1x128xf32>
    %cst_7 = arith.constant 9.99999974E-6 : f32
    %6 = vector.broadcast %cst_7 : f32 to vector<1x128xf32>
    %7 = arith.addf %5, %6 : vector<1x128xf32>
    %8 = math.rsqrt %7 : vector<1x128xf32>
    %9 = arith.mulf %4, %8 : vector<1x128xf32>
    %c0_8 = arith.constant 0 : index
    %c0_9 = arith.constant 0 : index
    %10 = vector.load %arg4[%c0_8, %c0_9] : memref<1x128xf32, #tpu.memory_space<vmem>>, vector<1x128xf32>
    %c0_10 = arith.constant 0 : index
    %c0_11 = arith.constant 0 : index
    %11 = vector.load %arg5[%c0_10, %c0_11] : memref<1x128xf32, #tpu.memory_space<vmem>>, vector<1x128xf32>
    %12 = arith.mulf %11, %9 : vector<1x128xf32>
    %13 = arith.subf %10, %12 : vector<1x128xf32>
    %14 = vector.broadcast %9 : vector<1x128xf32> to vector<32x128xf32>
    %15 = arith.mulf %3, %14 : vector<32x128xf32>
    %16 = vector.broadcast %13 : vector<1x128xf32> to vector<32x128xf32>
    %17 = arith.addf %15, %16 : vector<32x128xf32>
    %c0_12 = arith.constant 0 : index
    %c0_13 = arith.constant 0 : index
    %18 = vector.load %arg7[%c0_12, %c0_13] : memref<32x128xf32, #tpu.memory_space<vmem>>, vector<32x128xf32>
    tpu.vector_store %arg7[%c0_12, %c0_13], %17 {strides = array<i32>} : memref<32x128xf32, #tpu.memory_space<vmem>>, vector<32x128xf32>,
    return
  }
  func.func @transform_0(%arg0: i32) -> (i32, i32) {
    %c0_i32 = arith.constant 0 : i32
    %c0_i32_0 = arith.constant 0 : i32
    return %arg0, %c0_i32 : i32, i32
  }
  func.func @transform_1(%arg0: i32) -> (i32, i32) {
    %c0_i32 = arith.constant 0 : i32
    %c0_i32_0 = arith.constant 0 : i32
    %c0_i32_1 = arith.constant 0 : i32
    return %c0_i32, %c0_i32_0 : i32, i32
  }
  func.func @transform_2(%arg0: i32) -> (i32, i32) {
    %c0_i32 = arith.constant 0 : i32
    %c0_i32_0 = arith.constant 0 : i32
    %c0_i32_1 = arith.constant 0 : i32
    return %c0_i32, %c0_i32_0 : i32, i32
  }
  func.func @transform_3(%arg0: i32) -> (i32, i32) {
    %c0_i32 = arith.constant 0 : i32
    %c0_i32_0 = arith.constant 0 : i32
    %c0_i32_1 = arith.constant 0 : i32
    return %c0_i32, %c0_i32_0 : i32, i32
  }
  func.func @transform_4(%arg0: i32) -> (i32, i32) {
    %c0_i32 = arith.constant 0 : i32
    %c0_i32_0 = arith.constant 0 : i32
    %c0_i32_1 = arith.constant 0 : i32
    return %c0_i32, %c0_i32_0 : i32, i32
  }
  func.func @transform_5(%arg0: i32) -> (i32, i32) {
    %c0_i32 = arith.constant 0 : i32
    %c0_i32_0 = arith.constant 0 : i32
    %c0_i32_1 = arith.constant 0 : i32
    return %c0_i32, %c0_i32_0 : i32, i32
  }
  func.func @transform_6(%arg0: i32) -> (i32, i32) {
    %c0_i32 = arith.constant 0 : i32
    %c0_i32_0 = arith.constant 0 : i32
    return %arg0, %c0_i32 : i32, i32
  }
}

</mosaic_0001>

<bundles_post_ra>
// kernel: patch_embed.1
= control target key start
LH: loop header
LB: loop body
LE: loop exit
PB: predicated region body
PF: predicated region fallthrough
CT: control target
= control target key end

     0   :  { %vm63_vm0 = vcmask 523264   ;;  %s311_s0 = inlined_call_operand.vmem [shape: f32[32,64], index: 0, kind: input, shape index: {}]   ;;  %s312_s1 = inlined_call_operand.vmem [shape: bf16[64,128], index: 1, kind: input, shape index: {}]   ;;  %s313_s2 = inlined_call_operand.vmem [shape: f32[1,128], index: 2, kind: input, shape index: {}]   ;;  %s314_s3 = inlined_call_operand.vmem [shape: f32[1,128], index: 3, kind: input, shape index: {}]   ;;  %s315_s4 = inlined_call_operand.vmem [shape: f32[1,128], index: 4, kind: input, shape index: {}]   ;;  %s316_s5 = inlined_call_operand.vmem [shape: f32[1,128], index: 5, kind: input, shape index: {}]   ;;  %s317_s6 = inlined_call_operand.hbm [shape: f32[32,128], index: 6, kind: output, shape index: {}]  }
   0x1   :  { %v195_v0 = vld [vmem:[%s312_s1] sm:$0xff]   ;;  %v196_v1 = vld [vmem:[%s312_s1 + $0x8] sm:$0xff]   ;;  %v197_v2 = vld [vmem:[%s312_s1 + $0x10] sm:$0xff]  }
   0x2   :  { %180 = vmatprep.subr.bf16.mxu0 %v195_v0  ;;  %v25_v3 = vld [vmem:[%s311_s0] sm:$0xff]  ;;  %v26_v4 = vld [vmem:[%s311_s0 + $0x8] sm:$0xff] }
   0x3   :  { %181 = vmatpush3.bf16.msra.mxu0 %v195_v0  ;;  %v29_v5 = vpack.c.bf16 %v26_v4, %v25_v3 }
   0x4   :  { %182 = vmatprep.subr.bf16.mxu0 %v196_v1 }
   0x5   :  { %11 = vsyncpa [#allocation3], 0  ;;  %188 = vmatprep.mubr.msk.bf16.mxu0 %vm63_vm0, %v29_v5  ;;  %v198_v6 = vld [vmem:[%s312_s1 + $0x18] sm:$0xff]   ;;  %v27_v7 = vld [vmem:[%s311_s0 + $0x10] sm:$0xff]  ;;  %v129_v14 = vlaneseq }
   0x6   :  { %v28_v8 = vld [vmem:[%s311_s0 + $0x18] sm:$0xff]  ;;  %v120_v10 = vld [vmem:[%s316_s5] sm:$0x1] }
   0x7   :  { %183 = vmatpush3.bf16.msra.mxu0 %v196_v1  ;;  %v30_v9 = vpack.c.bf16 %v28_v8, %v27_v7  ;;  %v121_v11 = vadd.f32 1e-05, %v120_v10  ;;  %v119_v13 = vld [vmem:[%s313_s2] sm:$0x1]  ;;  %v130_v17 = vshrl.u32 %v129_v14, 7  ;;  %s225_s2 = smov [#allocation2]  }
   0x8   :  { %184 = vmatprep.subr.bf16.mxu0 %v197_v2  ;;  %v125_v16 = vld [vmem:[%s315_s4] sm:$0x1]  ;;  %s157_s5 = sshll.u32 %s225_s2, 4  ;;  %s158_s5 = int_to_ptr.vmem [resolvable:$true] %s157_s5 }
   0x9   :  { %199 = vrsqrt.f32 %v121_v11  ;;  %v124_v19 = vld [vmem:[%s314_s3] sm:$0x1]  ;;  %v131_v20 = vsub.s32 0, %v130_v17  ;;  %s201_s3 = scalar_lea.vmem %s158_s5, 512  ;;  %p206_p1 = scmp.lt.s32.totalorder %s158_s5, %s158_s5 }
   0xa   :  { %p202_p0 = scmp.ne.s32.totalorder %s158_s5, %s201_s3  ;;  %p207_p2 = scmp.lt.s32.totalorder %s201_s3, %s201_s3 }
   0xb   :  { %185 = vmatpush3.bf16.msra.mxu0 %v197_v2 }
   0xc   :  { %186 = vmatprep.subr.bf16.mxu0 %v198_v6  ;;  %p208_p3 = por %p207_p2, %p206_p1 }
   0xe   :  { %p209_p4 = pnand %p208_p3, %p202_p0 }
   0xf   :  { %187 = vmatpush3.bf16.msra.mxu0 %v198_v6 }
  0x12   :  { %189 = vmatmul.mubr.msk.bf16.vlgmr.msra.gmra.mrb[0].mxu0 %vm63_vm0, %v30_v9 }
  0x13   :  { %v200_v12 = vpop.eup %199 }
  0x14   :  { %v123_v15 = vmul.f32 %v200_v12, %v119_v13 }
  0x16   :  { %v126_v18 = vmul.f32 %v125_v16, %v123_v15  ;;  %v132_v22 = vrot.slane %v123_v15, %v131_v20 }
  0x18   :  { %v127_v21 = vsub.f32 %v124_v19, %v126_v18 }
  0x1a   :  { %v142_v23 = vrot.slane %v127_v21, %v131_v20 }
  0xe5   :  { %v190_v24 = vpop.f32.mrb[0].mxu0 }
  0xe6   :  { %v136_v25 = vmul.f32 %v190_v24, %v132_v22  ;;  %v104_v26 = vpop.f32.mrb[1].mxu0 }
  0xe7   :  { %v134_v27 = vmul.f32 %v132_v22, %v104_v26  ;;  %v191_v28 = vpop.f32.mrb[2].mxu0 }
  0xe8   :  { %v146_v29 = vadd.f32 %v142_v23, %v136_v25  ;;  %v137_v30 = vmul.f32 %v191_v28, %v132_v22  ;;  %v107_v31 = vpop.f32.mrb[3].mxu0 }
  0xe9   :  { %v144_v32 = vadd.f32 %v142_v23, %v134_v27  ;;  %v135_v33 = vmul.f32 %v132_v22, %v107_v31 }
  0xea   :  { %150 = vst [vmem:[#allocation2 + $0x10] sm:$0xff] %v146_v29  ;;  %v147_v34 = vadd.f32 %v142_v23, %v137_v30 }
  0xeb   :  { %148 = vst [vmem:[#allocation2] sm:$0xff] %v144_v32  ;;  %v145_v35 = vadd.f32 %v142_v23, %v135_v33 }
  0xec   :  { %151 = vst [vmem:[#allocation2 + $0x18] sm:$0xff] %v147_v34 }
  0xed   :  { %149 = vst [vmem:[#allocation2 + $0x8] sm:$0xff] %v145_v35 }
  0xee   :  { %212 = shalt.err (!%p209_p4)
}
  0xef   :  { %s213_s20 = scalar_lea.hbm %s317_s6, 512 }
  0xf0   :  { %p214_p5 = scmp.ne.s32.totalorder %s317_s6, %s213_s20  ;;  %p217_p6 = scmp.lt.u32.totalorder %s213_s20, %s317_s6 }
  0xf2   :  { %p219_p7 = pnand %p217_p6, %p214_p5 }
  0xf4   :  { %222 = shalt.err (!%p219_p7)
}
  0xf5   :  { %s226_s25 = smov 128   ;;  %s227_s26 = smov 8  }
  0xf6   :  { %163 = dma.vmem_to_hbm [thread:$0]  %s158_s5, 512, %s317_s6, [#allocation3], %s226_s25, %s226_s25, %s227_s26  }
  0xf7   :  { %223 = dma.done.wait [#allocation3], 512  }
  0xf8   :  { %224 = vsyncadd [#allocation3], 4294966784 }
  0xf9   :  { %167 = vsyncpa [#allocation3], 1 }

</bundles_post_ra>
